<compile_context>
chip_gen: v5e
topology: v5e:2x2
jax: 0.10.0
libtpu: 0.0.40
codegen_flags: <defaults>
</compile_context>

<pallas_src>
import functools

import jax
import jax.numpy as jnp
from jax.experimental import pallas as pl
from jax.experimental.pallas import tpu as pltpu


def _round_up(n, m):
    return ((n + m - 1) // m) * m


def _pad2(a, rows, cols):
    r, c = a.shape
    return jnp.pad(a, ((0, rows - r), (0, cols - c)))


def _vmem_capacity_bytes():
    """Per-core physical VMEM; conservative 64 MiB (v7x) fallback if the query fails."""
    try:
        cap = getattr(pltpu.get_tpu_info(), "vmem_capacity_bytes", None)
        if cap:
            return int(cap)
    except Exception:
        pass
    return 64 << 20


def _const_spec(shape):
    """Full-block input with a constant index_map (weights / biases).

    These are resident across the whole batch grid, so request a single VMEM buffer
    (halves the resident weight footprint vs the default double-buffering).
    """
    if hasattr(pl, "Buffered"):
        try:
            return pl.BlockSpec(shape, lambda b: (0, 0), pipeline_mode=pl.Buffered(1))
        except TypeError:
            pass
    return pl.BlockSpec(shape, lambda b: (0, 0))


def _star_kernel(x_ref, w1_ref, b1_ref, w2_ref, b2_ref,
                 w3a_ref, w3b_ref, b3_ref, w4_ref, b4_ref,
                 o_ref, *, tb, channels, approx_gelu):
    """One grid step: TB batch elements fused into a channel-major (C*TB, DS) slab.

    Row c*TB + b holds channel c of local batch b, so every per-batch channel
    reduction (softmax max / sums) is an elementwise op over C contiguous,
    sublane-aligned (TB, DC) row blocks — no reshapes, no selector matmuls.
    """
    gelu = functools.partial(jax.nn.gelu, approximate=approx_gelu)

    def mm(lhs, w_ref):
        # bf16 MXU operands (weights are stored bf16), f32 accumulation.
        return jnp.dot(lhs.astype(w_ref.dtype), w_ref[...],
                       preferred_element_type=jnp.float32)

    x2 = x_ref[...]                                              # (C*TB, DS) bf16

    # gen1 + gelu, gen2 (activations in f32)
    h = gelu(mm(x2, w1_ref) + b1_ref[...])                       # (R, DS)
    cm = mm(h, w2_ref) + b2_ref[...]                             # (R, DC)

    # Per-batch channel softmax + weighted channel-sum ("core"), exact per-batch max
    # stabilizer, all f32.  TODO(synk): for very large channel counts this unrolled
    # Python loop should become a fori_loop / extra grid axis.
    blocks = [cm[c * tb:(c + 1) * tb, :] for c in range(channels)]   # C x (TB, DC)
    m = blocks[0]
    for blk in blocks[1:]:
        m = jnp.maximum(m, blk)                                  # (TB, DC)
    denom = jnp.zeros_like(m)
    num = jnp.zeros_like(m)
    for blk in blocks:
        e = jnp.exp(blk - m)                                     # EUP
        denom = denom + e
        num = num + blk * e
    # denom >= 1 exactly (the per-batch max channel contributes exp(0) = 1),
    # so a plain f32 divide on this tiny (TB, DC) tensor is safe and cheap.
    core = num / denom                                           # (TB, DC)

    # gen3 on concat([x, core]) as a split matmul: the x part runs on the full slab,
    # the core part once per batch element (b3 folded in) and is then replicated to
    # the channel rows by an aligned sublane concat.
    g3x = mm(x2, w3a_ref)                                        # (R, DS)
    core_row = mm(core, w3b_ref) + b3_ref[...]                   # (TB, DS)
    core_rows = jnp.concatenate([core_row] * channels, axis=0)   # (R, DS)
    h3 = gelu(g3x + core_rows)                                   # (R, DS)

    # gen4 — lane-dense, unmasked (R, DS) store.
    o_ref[...] = (mm(h3, w4_ref) + b4_ref[...]).astype(o_ref.dtype)


def _choose_batch_tile(B, C, DS, DC, in_item, out_item, act_budget):
    """Pick TB = batch elements fused per grid step.

    TB is a multiple of 8 (sublane-aligned per-channel row blocks), large enough that
    each slab gives the MXU >= ~512 rows, small enough to fit the per-step VMEM
    activation/IO budget, and (when B allows) small enough to leave >= 2 grid steps
    so both v7x TensorCores get work via the 'parallel' batch axis.
    """
    per_row = (2 * in_item + 2 * out_item) * DS + (4 * DS + 3 * DC) * 4
    vmem_tb = max(8, (act_budget // max(per_row * C, 1)) // 8 * 8)
    target_tb = _round_up(max(1, -(-512 // C)), 8)
    split_tb = max(8, _round_up(-(-B // 2), 8))
    return max(8, min(vmem_tb, target_tb, split_tb))


@functools.partial(jax.jit,
                   static_argnames=("approx_gelu", "block_batch", "compute_dtype"))
def star_forward(x, params, *, approx_gelu=True, block_batch=None,
                 compute_dtype=jnp.bfloat16):
    """Eval-mode STAR forward.  x: (B, C, d_series); params from init_params.

    Returns (output, None) like the PyTorch module.
    """
    B, C, d_series = x.shape
    d_core = params["w2"].shape[1]
    in_item = jnp.dtype(compute_dtype).itemsize
    out_item = jnp.dtype(x.dtype).itemsize

    # Pad feature dims to the 128-lane width once, outside the kernel (zeros are
    # exact: gelu(0)=0 and zero rows/cols contribute nothing; padded columns are
    # sliced off).  Weights go to bf16 (native MXU rate); biases stay f32 since they
    # are added to f32 accumulators.
    DS = _round_up(d_series, 128)
    DC = _round_up(d_core, 128)
    wdt = compute_dtype
    w1 = _pad2(params["w1"], DS, DS).astype(wdt); b1 = _pad2(params["b1"], 1, DS)
    w2 = _pad2(params["w2"], DS, DC).astype(wdt); b2 = _pad2(params["b2"], 1, DC)
    w3a = _pad2(params["w3a"], DS, DS).astype(wdt)
    w3b = _pad2(params["w3b"], DC, DS).astype(wdt)
    b3 = _pad2(params["b3"], 1, DS)
    w4 = _pad2(params["w4"], DS, DS).astype(wdt); b4 = _pad2(params["b4"], 1, DS)
    consts = (w1, b1, w2, b2, w3a, w3b, b3, w4, b4)
    weight_bytes = sum(int(a.size) * a.dtype.itemsize for a in consts)

    # Per-chip VMEM budget (v5e/v6e: 128 MiB, v7x: 64 MiB per core).  Weights are
    # single-buffered and resident; the remainder is the per-step activation/IO
    # budget used to size TB.
    vmem_usable = (_vmem_capacity_bytes() * 3) // 4
    act_budget = max(vmem_usable - weight_bytes - (6 << 20), 2 << 20)
    # TODO(synk): when the resident weights alone crowd vmem_usable (very large
    # d_series), tile the output-feature dim of W1/W3a/W4 on an extra 'arbitrary'
    # grid axis instead of relying on bf16 + single buffering.

    if block_batch is None:
        tb = _choose_batch_tile(B, C, DS, DC, in_item, out_item, act_budget)
    else:
        tb = max(8, _round_up(int(block_batch), 8))
    Bp = _round_up(B, tb)

    # Channel-major slab: within each tile of TB batches, rows are ordered
    # (channel, batch) so the kernel sees C contiguous (TB, DS) channel blocks.
    # Padded batches are independent rows; the per-batch softmax never mixes them
    # with real ones, and their outputs are sliced off below.
    xp = x
    if Bp != B or DS != d_series:
        xp = jnp.pad(x, ((0, Bp - B), (0, 0), (0, DS - d_series)))
    x2 = (xp.reshape(Bp // tb, tb, C, DS)
            .transpose(0, 2, 1, 3)
            .reshape(Bp * C, DS)
            .astype(compute_dtype))

    rows = Bp * C
    cost = pl.CostEstimate(
        flops=2 * rows * DS * (3 * DS + DC) + 2 * Bp * DC * DS,
        transcendentals=rows * (2 * DS + DC),
        bytes_accessed=weight_bytes + rows * DS * (in_item + out_item),
    )

    kernel = functools.partial(_star_kernel, tb=tb, channels=C,
                               approx_gelu=approx_gelu)
    out_flat = pl.pallas_call(
        kernel,
        out_shape=jax.ShapeDtypeStruct((rows, DS), x.dtype),
        grid_spec=pltpu.PrefetchScalarGridSpec(
            num_scalar_prefetch=0,
            grid=(Bp // tb,),
            in_specs=[
                pl.BlockSpec((tb * C, DS), lambda b: (b, 0)),     # x slab (pipelined)
                _const_spec((DS, DS)), _const_spec((1, DS)),      # W1, b1
                _const_spec((DS, DC)), _const_spec((1, DC)),      # W2, b2
                _const_spec((DS, DS)),                            # W3a
                _const_spec((DC, DS)),                            # W3b
                _const_spec((1, DS)),                             # b3
                _const_spec((DS, DS)), _const_spec((1, DS)),      # W4, b4
            ],
            out_specs=pl.BlockSpec((tb * C, DS), lambda b: (b, 0)),
        ),
        compiler_params=pltpu.CompilerParams(
            dimension_semantics=("parallel",),
            vmem_limit_bytes=int(vmem_usable),
        ),
        cost_estimate=cost,
    )(x2, *consts)

    # Undo the channel-major tiling and strip the batch / feature padding.
    out = (out_flat.reshape(Bp // tb, C, tb, DS)
                   .transpose(0, 2, 1, 3)
                   .reshape(Bp, C, DS)[:B, :, :d_series])
    return out, None


def init_params(key, d_series, d_core):
    """Deterministic init. Weights stored as (in_features, out_features)."""
    ks = jax.random.split(key, 8)

    def lin(kw, kb, fan_in, fan_out):
        bound = 1.0 / jnp.sqrt(fan_in)
        w = jax.random.uniform(kw, (fan_in, fan_out), jnp.float32, -bound, bound)
        b = jax.random.uniform(kb, (1, fan_out), jnp.float32, -bound, bound)
        return w, b

    w1, b1 = lin(ks[0], ks[1], d_series, d_series)
    w2, b2 = lin(ks[2], ks[3], d_series, d_core)
    w3, b3 = lin(ks[4], ks[5], d_series + d_core, d_series)
    w4, b4 = lin(ks[6], ks[7], d_series, d_series)
    return {
        "w1": w1, "b1": b1,
        "w2": w2, "b2": b2,
        "w3a": w3[:d_series, :], "w3b": w3[d_series:, :], "b3": b3,
        "w4": w4, "b4": b4,
    }


def star_reference(x, params):
    """Pure-JAX f32 reference of the PyTorch eval-mode forward (exact erf GELU)."""
    h = jax.nn.gelu(x @ params["w1"] + params["b1"][0], approximate=False)
    cm = h @ params["w2"] + params["b2"][0]
    w = jax.nn.softmax(cm, axis=1)
    core = jnp.sum(cm * w, axis=1, keepdims=True)
    core = jnp.broadcast_to(core, cm.shape)
    cat = jnp.concatenate([x, core], axis=-1)
    w3 = jnp.concatenate([params["w3a"], params["w3b"]], axis=0)
    h3 = jax.nn.gelu(cat @ w3 + params["b3"][0], approximate=False)
    return h3 @ params["w4"] + params["b4"][0]


if __name__ == "__main__":
    B, C, d_series, d_core = 2, 4, 16, 8
    key = jax.random.PRNGKey(0)
    kx, kp = jax.random.split(key)
    x = jax.random.normal(kx, (B, C, d_series), jnp.float32)
    params = init_params(kp, d_series, d_core)

    # TODO(synk): the training-mode branch (torch.multinomial channel sampling +
    # gather) is not ported; only the deterministic eval path is implemented.

    out, _ = star_forward(x, params)
    out = jax.block_until_ready(out)
    ref = star_reference(x, params)

    assert out.shape == (B, C, d_series)
    # bf16 MXU operands + tanh-GELU default vs the f32/erf reference: ~1e-2 drift.
    err = jnp.max(jnp.abs(out - ref))
    assert jnp.allclose(out, ref, atol=3e-2, rtol=3e-2), (
        f"mismatch vs reference: max abs err {err}")
    print("KERNEL_OK")
</pallas_src>

<mosaic_0001>
module attributes {stable_mosaic.version = 11 : i64} {
  func.func @_star_kernel(%arg0: i32, %arg1: memref<32x128xbf16, #tpu.memory_space<vmem>>, %arg2: memref<128x128xbf16, #tpu.memory_space<vmem>>, %arg3: memref<1x128xf32, #tpu.memory_space<vmem>>, %arg4: memref<128x128xbf16, #tpu.memory_space<vmem>>, %arg5: memref<1x128xf32, #tpu.memory_space<vmem>>, %arg6: memref<128x128xbf16, #tpu.memory_space<vmem>>, %arg7: memref<128x128xbf16, #tpu.memory_space<vmem>>, %arg8: memref<1x128xf32, #tpu.memory_space<vmem>>, %arg9: memref<128x128xbf16, #tpu.memory_space<vmem>>, %arg10: memref<1x128xf32, #tpu.memory_space<vmem>>, %arg11: memref<32x128xf32, #tpu.memory_space<vmem>>) attributes {dimension_semantics = [#tpu.dimension_semantics<parallel>], iteration_bounds = array<i64: 1>, scalar_prefetch = 0 : i64, scratch_operands = 0 : i64, tpu.core_type = #tpu.core_type<tc>, window_params = [{transform_indices = @transform_0, window_bounds = array<i64: 32, 128>}, {pipeline_mode = #tpu.pipeline_mode<synchronous>, transform_indices = @transform_1, window_bounds = array<i64: 128, 128>}, {pipeline_mode = #tpu.pipeline_mode<synchronous>, transform_indices = @transform_2, window_bounds = array<i64: 1, 128>}, {pipeline_mode = #tpu.pipeline_mode<synchronous>, transform_indices = @transform_3, window_bounds = array<i64: 128, 128>}, {pipeline_mode = #tpu.pipeline_mode<synchronous>, transform_indices = @transform_4, window_bounds = array<i64: 1, 128>}, {pipeline_mode = #tpu.pipeline_mode<synchronous>, transform_indices = @transform_5, window_bounds = array<i64: 128, 128>}, {pipeline_mode = #tpu.pipeline_mode<synchronous>, transform_indices = @transform_6, window_bounds = array<i64: 128, 128>}, {pipeline_mode = #tpu.pipeline_mode<synchronous>, transform_indices = @transform_7, window_bounds = array<i64: 1, 128>}, {pipeline_mode = #tpu.pipeline_mode<synchronous>, transform_indices = @transform_8, window_bounds = array<i64: 128, 128>}, {pipeline_mode = #tpu.pipeline_mode<synchronous>, transform_indices = @transform_9, window_bounds = array<i64: 1, 128>}, {transform_indices = @transform_10, window_bounds = array<i64: 32, 128>}]} {
    %c0 = arith.constant 0 : index
    %c0_0 = arith.constant 0 : index
    %0 = vector.load %arg1[%c0, %c0_0] : memref<32x128xbf16, #tpu.memory_space<vmem>>, vector<32x128xbf16>
    %c0_1 = arith.constant 0 : index
    %c0_2 = arith.constant 0 : index
    %1 = vector.load %arg2[%c0_1, %c0_2] : memref<128x128xbf16, #tpu.memory_space<vmem>>, vector<128x128xbf16>
    %cst = arith.constant dense<0.000000e+00> : vector<32x128xf32>
    %2 = tpu.matmul %0, %1, %cst {dimension_numbers = #tpu.dot_dimension_numbers<[1], [0], [0], [1], [0, 0, 1, 1], [], []>} : vector<32x128xbf16>, vector<128x128xbf16>, vector<32x128xf32> -> vector<32x128xf32>
    %c0_3 = arith.constant 0 : index
    %c0_4 = arith.constant 0 : index
    %3 = vector.load %arg3[%c0_3, %c0_4] : memref<1x128xf32, #tpu.memory_space<vmem>>, vector<1x128xf32>
    %4 = vector.broadcast %3 : vector<1x128xf32> to vector<32x128xf32>
    %5 = arith.addf %2, %4 : vector<32x128xf32>
    %6 = arith.mulf %5, %5 : vector<32x128xf32>
    %7 = arith.mulf %5, %6 : vector<32x128xf32>
    %cst_5 = arith.constant 4.471500e-02 : f32
    %8 = vector.broadcast %cst_5 : f32 to vector<32x128xf32>
    %9 = arith.mulf %8, %7 : vector<32x128xf32>
    %10 = arith.addf %5, %9 : vector<32x128xf32>
    %cst_6 = arith.constant 0.797884583 : f32
    %11 = vector.broadcast %cst_6 : f32 to vector<32x128xf32>
    %12 = arith.mulf %11, %10 : vector<32x128xf32>
    %13 = math.tanh %12 : vector<32x128xf32>
    %cst_7 = arith.constant 1.000000e+00 : f32
    %14 = vector.broadcast %cst_7 : f32 to vector<32x128xf32>
    %15 = arith.addf %14, %13 : vector<32x128xf32>
    %cst_8 = arith.constant 5.000000e-01 : f32
    %16 = vector.broadcast %cst_8 : f32 to vector<32x128xf32>
    %17 = arith.mulf %16, %15 : vector<32x128xf32>
    %18 = arith.mulf %5, %17 : vector<32x128xf32>
    %19 = arith.truncf %18 : vector<32x128xf32> to vector<32x128xbf16>
    %c0_9 = arith.constant 0 : index
    %c0_10 = arith.constant 0 : index
    %20 = vector.load %arg4[%c0_9, %c0_10] : memref<128x128xbf16, #tpu.memory_space<vmem>>, vector<128x128xbf16>
    %cst_11 = arith.constant dense<0.000000e+00> : vector<32x128xf32>
    %21 = tpu.matmul %19, %20, %cst_11 {dimension_numbers = #tpu.dot_dimension_numbers<[1], [0], [0], [1], [0, 0, 1, 1], [], []>} : vector<32x128xbf16>, vector<128x128xbf16>, vector<32x128xf32> -> vector<32x128xf32>
    %c0_12 = arith.constant 0 : index
    %c0_13 = arith.constant 0 : index
    %22 = vector.load %arg5[%c0_12, %c0_13] : memref<1x128xf32, #tpu.memory_space<vmem>>, vector<1x128xf32>
    %23 = vector.broadcast %22 : vector<1x128xf32> to vector<32x128xf32>
    %24 = arith.addf %21, %23 : vector<32x128xf32>
    %25 = vector.extract_strided_slice %24 {offsets = [0, 0], sizes = [8, 128], strides = [1, 1]} : vector<32x128xf32> to vector<8x128xf32>
    %26 = vector.extract_strided_slice %24 {offsets = [8, 0], sizes = [8, 128], strides = [1, 1]} : vector<32x128xf32> to vector<8x128xf32>
    %27 = vector.extract_strided_slice %24 {offsets = [16, 0], sizes = [8, 128], strides = [1, 1]} : vector<32x128xf32> to vector<8x128xf32>
    %28 = vector.extract_strided_slice %24 {offsets = [24, 0], sizes = [8, 128], strides = [1, 1]} : vector<32x128xf32> to vector<8x128xf32>
    %29 = arith.maximumf %25, %26 : vector<8x128xf32>
    %30 = arith.maximumf %29, %27 : vector<8x128xf32>
    %31 = arith.maximumf %30, %28 : vector<8x128xf32>
    %cst_14 = arith.constant 0.000000e+00 : f32
    %32 = vector.broadcast %cst_14 : f32 to vector<8x128xf32>
    %cst_15 = arith.constant 0.000000e+00 : f32
    %33 = vector.broadcast %cst_15 : f32 to vector<8x128xf32>
    %34 = arith.subf %25, %31 : vector<8x128xf32>
    %35 = math.exp %34 : vector<8x128xf32>
    %36 = arith.addf %32, %35 : vector<8x128xf32>
    %37 = arith.mulf %25, %35 : vector<8x128xf32>
    %38 = arith.addf %33, %37 : vector<8x128xf32>
    %39 = arith.subf %26, %31 : vector<8x128xf32>
    %40 = math.exp %39 : vector<8x128xf32>
    %41 = arith.addf %36, %40 : vector<8x128xf32>
    %42 = arith.mulf %26, %40 : vector<8x128xf32>
    %43 = arith.addf %38, %42 : vector<8x128xf32>
    %44 = arith.subf %27, %31 : vector<8x128xf32>
    %45 = math.exp %44 : vector<8x128xf32>
    %46 = arith.addf %41, %45 : vector<8x128xf32>
    %47 = arith.mulf %27, %45 : vector<8x128xf32>
    %48 = arith.addf %43, %47 : vector<8x128xf32>
    %49 = arith.subf %28, %31 : vector<8x128xf32>
    %50 = math.exp %49 : vector<8x128xf32>
    %51 = arith.addf %46, %50 : vector<8x128xf32>
    %52 = arith.mulf %28, %50 : vector<8x128xf32>
    %53 = arith.addf %48, %52 : vector<8x128xf32>
    %54 = arith.divf %53, %51 : vector<8x128xf32>
    %c0_16 = arith.constant 0 : index
    %c0_17 = arith.constant 0 : index
    %55 = vector.load %arg6[%c0_16, %c0_17] : memref<128x128xbf16, #tpu.memory_space<vmem>>, vector<128x128xbf16>
    %cst_18 = arith.constant dense<0.000000e+00> : vector<32x128xf32>
    %56 = tpu.matmul %0, %55, %cst_18 {dimension_numbers = #tpu.dot_dimension_numbers<[1], [0], [0], [1], [0, 0, 1, 1], [], []>} : vector<32x128xbf16>, vector<128x128xbf16>, vector<32x128xf32> -> vector<32x128xf32>
    %57 = arith.truncf %54 : vector<8x128xf32> to vector<8x128xbf16>
    %c0_19 = arith.constant 0 : index
    %c0_20 = arith.constant 0 : index
    %58 = vector.load %arg7[%c0_19, %c0_20] : memref<128x128xbf16, #tpu.memory_space<vmem>>, vector<128x128xbf16>
    %cst_21 = arith.constant dense<0.000000e+00> : vector<8x128xf32>
    %59 = tpu.matmul %57, %58, %cst_21 {dimension_numbers = #tpu.dot_dimension_numbers<[1], [0], [0], [1], [0, 0, 1, 1], [], []>} : vector<8x128xbf16>, vector<128x128xbf16>, vector<8x128xf32> -> vector<8x128xf32>
    %c0_22 = arith.constant 0 : index
    %c0_23 = arith.constant 0 : index
    %60 = vector.load %arg8[%c0_22, %c0_23] : memref<1x128xf32, #tpu.memory_space<vmem>>, vector<1x128xf32>
    %61 = vector.broadcast %60 : vector<1x128xf32> to vector<8x128xf32>
    %62 = arith.addf %59, %61 : vector<8x128xf32>
    %63 = tpu.concatenate %62, %62, %62, %62 in 0 : vector<8x128xf32>, vector<8x128xf32>, vector<8x128xf32>, vector<8x128xf32> -> vector<32x128xf32>
    %64 = arith.addf %56, %63 : vector<32x128xf32>
    %65 = arith.mulf %64, %64 : vector<32x128xf32>
    %66 = arith.mulf %64, %65 : vector<32x128xf32>
    %cst_24 = arith.constant 4.471500e-02 : f32
    %67 = vector.broadcast %cst_24 : f32 to vector<32x128xf32>
    %68 = arith.mulf %67, %66 : vector<32x128xf32>
    %69 = arith.addf %64, %68 : vector<32x128xf32>
    %cst_25 = arith.constant 0.797884583 : f32
    %70 = vector.broadcast %cst_25 : f32 to vector<32x128xf32>
    %71 = arith.mulf %70, %69 : vector<32x128xf32>
    %72 = math.tanh %71 : vector<32x128xf32>
    %cst_26 = arith.constant 1.000000e+00 : f32
    %73 = vector.broadcast %cst_26 : f32 to vector<32x128xf32>
    %74 = arith.addf %73, %72 : vector<32x128xf32>
    %cst_27 = arith.constant 5.000000e-01 : f32
    %75 = vector.broadcast %cst_27 : f32 to vector<32x128xf32>
    %76 = arith.mulf %75, %74 : vector<32x128xf32>
    %77 = arith.mulf %64, %76 : vector<32x128xf32>
    %78 = arith.truncf %77 : vector<32x128xf32> to vector<32x128xbf16>
    %c0_28 = arith.constant 0 : index
    %c0_29 = arith.constant 0 : index
    %79 = vector.load %arg9[%c0_28, %c0_29] : memref<128x128xbf16, #tpu.memory_space<vmem>>, vector<128x128xbf16>
    %cst_30 = arith.constant dense<0.000000e+00> : vector<32x128xf32>
    %80 = tpu.matmul %78, %79, %cst_30 {dimension_numbers = #tpu.dot_dimension_numbers<[1], [0], [0], [1], [0, 0, 1, 1], [], []>} : vector<32x128xbf16>, vector<128x128xbf16>, vector<32x128xf32> -> vector<32x128xf32>
    %c0_31 = arith.constant 0 : index
    %c0_32 = arith.constant 0 : index
    %81 = vector.load %arg10[%c0_31, %c0_32] : memref<1x128xf32, #tpu.memory_space<vmem>>, vector<1x128xf32>
    %82 = vector.broadcast %81 : vector<1x128xf32> to vector<32x128xf32>
    %83 = arith.addf %80, %82 : vector<32x128xf32>
    %c0_33 = arith.constant 0 : index
    %c0_34 = arith.constant 0 : index
    %84 = vector.load %arg11[%c0_33, %c0_34] : memref<32x128xf32, #tpu.memory_space<vmem>>, vector<32x128xf32>
    tpu.vector_store %arg11[%c0_33, %c0_34], %83 {strides = array<i32>} : memref<32x128xf32, #tpu.memory_space<vmem>>, vector<32x128xf32>,
    return
  }
  func.func @transform_0(%arg0: i32) -> (i32, i32) {
    %c0_i32 = arith.constant 0 : i32
    %c0_i32_0 = arith.constant 0 : i32
    return %arg0, %c0_i32 : i32, i32
  }
  func.func @transform_1(%arg0: i32) -> (i32, i32) {
    %c0_i32 = arith.constant 0 : i32
    %c0_i32_0 = arith.constant 0 : i32
    %c0_i32_1 = arith.constant 0 : i32
    return %c0_i32, %c0_i32_0 : i32, i32
  }
  func.func @transform_2(%arg0: i32) -> (i32, i32) {
    %c0_i32 = arith.constant 0 : i32
    %c0_i32_0 = arith.constant 0 : i32
    %c0_i32_1 = arith.constant 0 : i32
    return %c0_i32, %c0_i32_0 : i32, i32
  }
  func.func @transform_3(%arg0: i32) -> (i32, i32) {
    %c0_i32 = arith.constant 0 : i32
    %c0_i32_0 = arith.constant 0 : i32
    %c0_i32_1 = arith.constant 0 : i32
    return %c0_i32, %c0_i32_0 : i32, i32
  }
  func.func @transform_4(%arg0: i32) -> (i32, i32) {
    %c0_i32 = arith.constant 0 : i32
    %c0_i32_0 = arith.constant 0 : i32
    %c0_i32_1 = arith.constant 0 : i32
    return %c0_i32, %c0_i32_0 : i32, i32
  }
  func.func @transform_5(%arg0: i32) -> (i32, i32) {
    %c0_i32 = arith.constant 0 : i32
    %c0_i32_0 = arith.constant 0 : i32
    %c0_i32_1 = arith.constant 0 : i32
    return %c0_i32, %c0_i32_0 : i32, i32
  }
  func.func @transform_6(%arg0: i32) -> (i32, i32) {
    %c0_i32 = arith.constant 0 : i32
    %c0_i32_0 = arith.constant 0 : i32
    %c0_i32_1 = arith.constant 0 : i32
    return %c0_i32, %c0_i32_0 : i32, i32
  }
  func.func @transform_7(%arg0: i32) -> (i32, i32) {
    %c0_i32 = arith.constant 0 : i32
    %c0_i32_0 = arith.constant 0 : i32
    %c0_i32_1 = arith.constant 0 : i32
    return %c0_i32, %c0_i32_0 : i32, i32
  }
  func.func @transform_8(%arg0: i32) -> (i32, i32) {
    %c0_i32 = arith.constant 0 : i32
    %c0_i32_0 = arith.constant 0 : i32
    %c0_i32_1 = arith.constant 0 : i32
    return %c0_i32, %c0_i32_0 : i32, i32
  }
  func.func @transform_9(%arg0: i32) -> (i32, i32) {
    %c0_i32 = arith.constant 0 : i32
    %c0_i32_0 = arith.constant 0 : i32
    %c0_i32_1 = arith.constant 0 : i32
    return %c0_i32, %c0_i32_0 : i32, i32
  }
  func.func @transform_10(%arg0: i32) -> (i32, i32) {
    %c0_i32 = arith.constant 0 : i32
    %c0_i32_0 = arith.constant 0 : i32
    return %arg0, %c0_i32 : i32, i32
  }
}

</mosaic_0001>

<bundles_post_ra>
// kernel: star_forward.1
= control target key start
LH: loop header
LB: loop body
LE: loop exit
PB: predicated region body
PF: predicated region fallthrough
CT: control target
= control target key end

     0   :  { %s1056_s1 = inlined_call_operand.vmem [shape: bf16[128,128], index: 1, kind: input, shape index: {}]   ;;  %s1057_s2 = inlined_call_operand.vmem [shape: f32[1,128], index: 2, kind: input, shape index: {}]   ;;  %s1058_s0 = inlined_call_operand.vmem [shape: bf16[32,128], index: 0, kind: input, shape index: {}]   ;;  %s1059_s4 = inlined_call_operand.vmem [shape: f32[1,128], index: 4, kind: input, shape index: {}]   ;;  %s1060_s3 = inlined_call_operand.vmem [shape: bf16[128,128], index: 3, kind: input, shape index: {}]   ;;  %s1061_s5 = inlined_call_operand.vmem [shape: bf16[128,128], index: 5, kind: input, shape index: {}]   ;;  %s1062_s6 = inlined_call_operand.vmem [shape: bf16[128,128], index: 6, kind: input, shape index: {}]   ;;  %s1063_s7 = inlined_call_operand.vmem [shape: f32[1,128], index: 7, kind: input, shape index: {}]   ;;  %s1064_s9 = inlined_call_operand.vmem [shape: f32[1,128], index: 9, kind: input, shape index: {}]   ;;  %s1065_s8 = inlined_call_operand.vmem [shape: bf16[128,128], index: 8, kind: input, shape index: {}]   ;;  %s1066_s10 = inlined_call_operand.vmem [shape: f32[32,128], index: 10, kind: output, shape index: {}]  }
   0x1   :  { %v780_v0 = vld [vmem:[%s1056_s1 + $0x38] sm:$0xff]  ;;  %v779_v1 = vld [vmem:[%s1056_s1 + $0x30] sm:$0xff]  ;;  %v778_v2 = vld [vmem:[%s1056_s1 + $0x28] sm:$0xff] }
   0x2   :  { %119 = vmatpush.bf16.msra.mxu2 %v780_v0  ;;  %v777_v3 = vld [vmem:[%s1056_s1 + $0x20] sm:$0xff]  ;;  %v776_v4 = vld [vmem:[%s1056_s1 + $0x18] sm:$0xff]  ;;  %v775_v5 = vld [vmem:[%s1056_s1 + $0x10] sm:$0xff] }
   0x3   :  { %v774_v6 = vld [vmem:[%s1056_s1 + $0x8] sm:$0xff]  ;;  %v773_v7 = vld [vmem:[%s1056_s1] sm:$0xff]  ;;  %v788_v10 = vld [vmem:[%s1060_s3 + $0x38] sm:$0xff] }
   0x4   :  { %v925_v8 = vld [vmem:[%s1058_s0] sm:$0xff]  ;;  %v931_v9 = vld [vmem:[%s1058_s0 + $0x8] sm:$0xff]  ;;  %244 = vmatpush.bf16.msra.mxu1 %v788_v10  ;;  %v787_v11 = vld [vmem:[%s1060_s3 + $0x30] sm:$0xff] }
   0x5   :  { %v786_v12 = vld [vmem:[%s1060_s3 + $0x28] sm:$0xff]  ;;  %v785_v13 = vld [vmem:[%s1060_s3 + $0x20] sm:$0xff]  ;;  %v784_v14 = vld [vmem:[%s1060_s3 + $0x18] sm:$0xff] }
   0x6   :  { %120 = vmatpush.bf16.msra.mxu2 %v779_v1  ;;  %v783_v15 = vld [vmem:[%s1060_s3 + $0x10] sm:$0xff]  ;;  %v782_v16 = vld [vmem:[%s1060_s3 + $0x8] sm:$0xff]  ;;  %v813_v17 = vld [vmem:[%s1057_s2] ss:$0 sm:$0xff] }
   0x7   :  { %v781_v18 = vld [vmem:[%s1060_s3] sm:$0xff]  ;;  %v796_v1 = vld [vmem:[%s1061_s5 + $0x38] sm:$0xff] }
   0x8   :  { %245 = vmatpush.bf16.msra.mxu1 %v787_v11  ;;  %451 = vmatpush.bf16.msra.mxu3 %v796_v1  ;;  %v804_v10 = vld [vmem:[%s1062_s6 + $0x38] sm:$0xff]  ;;  %v790_v11 = vld [vmem:[%s1061_s5 + $0x8] sm:$0xff]  ;;  %v811_v1 = vld [vmem:[%s1065_s8 + $0x30] sm:$0xff] }
   0xa   :  { %121 = vmatpush.bf16.msra.mxu2 %v778_v2  ;;  %v795_v2 = vld [vmem:[%s1061_s5 + $0x30] sm:$0xff] }
   0xc   :  { %246 = vmatpush.bf16.msra.mxu1 %v786_v12  ;;  %452 = vmatpush.bf16.msra.mxu3 %v795_v2  ;;  %v810_v2 = vld [vmem:[%s1065_s8 + $0x28] sm:$0xff] }
   0xe   :  { %122 = vmatpush.bf16.msra.mxu2 %v777_v3  ;;  %v794_v3 = vld [vmem:[%s1061_s5 + $0x28] sm:$0xff] }
  0x10   :  { %247 = vmatpush.bf16.msra.mxu1 %v785_v13  ;;  %453 = vmatpush.bf16.msra.mxu3 %v794_v3  ;;  %v803_v13 = vld [vmem:[%s1062_s6 + $0x30] sm:$0xff]  ;;  %v809_v3 = vld [vmem:[%s1065_s8 + $0x20] sm:$0xff] }
  0x12   :  { %123 = vmatpush.bf16.msra.mxu2 %v776_v4  ;;  %v793_v4 = vld [vmem:[%s1061_s5 + $0x20] sm:$0xff] }
  0x14   :  { %248 = vmatpush.bf16.msra.mxu1 %v784_v14  ;;  %454 = vmatpush.bf16.msra.mxu3 %v793_v4  ;;  %v789_v14 = vld [vmem:[%s1061_s5] sm:$0xff] }
  0x16   :  { %124 = vmatpush.bf16.msra.mxu2 %v775_v5  ;;  %v792_v5 = vld [vmem:[%s1061_s5 + $0x18] sm:$0xff] }
  0x18   :  { %249 = vmatpush.bf16.msra.mxu1 %v783_v15  ;;  %455 = vmatpush.bf16.msra.mxu3 %v792_v5  ;;  %v802_v15 = vld [vmem:[%s1062_s6 + $0x28] sm:$0xff]  ;;  %v808_v5 = vld [vmem:[%s1065_s8 + $0x18] sm:$0xff] }
  0x1a   :  { %125 = vmatpush.bf16.msra.mxu2 %v774_v6 }
  0x1c   :  { %250 = vmatpush.bf16.msra.mxu1 %v782_v16  ;;  %v801_v16 = vld [vmem:[%s1062_s6 + $0x20] sm:$0xff] }
  0x1e   :  { %126 = vmatpush.bf16.msra.mxu2 %v773_v7  ;;  %v791_v7 = vld [vmem:[%s1061_s5 + $0x10] sm:$0xff] }
  0x1f   :  { %456 = vmatpush.bf16.msra.mxu3 %v791_v7  ;;  %v806_v7 = vld [vmem:[%s1065_s8 + $0x8] sm:$0xff] }
  0x20   :  { %251 = vmatpush.bf16.msra.mxu1 %v781_v18  ;;  %v814_v18 = vld [vmem:[%s1059_s4] ss:$0 sm:$0xff] }
  0x21   :  { %127 = vmatmul.bf16.vlgmr.msra.gmra.mxu2 %v925_v8 }
  0x22   :  { %390 = vmatpush.bf16.msrb.mxu2 %v804_v10 }
  0x23   :  { %457 = vmatpush.bf16.msra.mxu3 %v790_v11  ;;  %v805_v11 = vld [vmem:[%s1065_s8] sm:$0xff] }
  0x26   :  { %391 = vmatpush.bf16.msrb.mxu2 %v803_v13 }
  0x27   :  { %458 = vmatpush.bf16.msra.mxu3 %v789_v14 }
  0x2a   :  { %392 = vmatpush.bf16.msrb.mxu2 %v802_v15  ;;  %459 = vmatmul.bf16.vlgmr.msra.gmra.mxu3 %v925_v8 }
  0x2e   :  { %393 = vmatpush.bf16.msrb.mxu2 %v801_v16 }
  0x31   :  { %132 = vmatmul.bf16.gmra.mxu2 %v931_v9 }
  0x3a   :  { %464 = vmatmul.bf16.gmra.mxu3 %v931_v9 }
  0xa4   :  { %v128_v19 = vpop.f32.mrf.mxu2 }
  0xa5   :  { %v129_v20 = vadd.f32 %v813_v17, %v128_v19 }
  0xa7   :  { %v138_v21 = vmul.f32 %v129_v20, %v129_v20 }
  0xa9   :  { %v142_v22 = vmul.f32 %v138_v21, %v129_v20 }
  0xab   :  { %v146_v23 = vmul.f32 0.044715, %v142_v22 }
  0xac   :  { %v130_v24 = vpop.f32.mrf.mxu2 }
  0xad   :  { %v150_v25 = vadd.f32 %v146_v23, %v129_v20  ;;  %v131_v26 = vadd.f32 %v813_v17, %v130_v24  ;;  %v799_v24 = vld [vmem:[%s1062_s6 + $0x10] sm:$0xff] }
  0xaf   :  { %v139_v27 = vmul.f32 %v131_v26, %v131_v26  ;;  %v154_v28 = vmul.f32 0.7978846, %v150_v25 }
  0xb1   :  { %v143_v29 = vmul.f32 %v139_v27, %v131_v26  ;;  %817 = vtanh.f32 %v154_v28  ;;  %v798_v28 = vld [vmem:[%s1062_s6 + $0x8] sm:$0xff] }
  0xb3   :  { %v147_v30 = vmul.f32 0.044715, %v143_v29 }
  0xb4   :  { %v133_v31 = vpop.f32.mrf.mxu2 }
  0xb5   :  { %v151_v32 = vadd.f32 %v147_v30, %v131_v26  ;;  %v134_v33 = vadd.f32 %v813_v17, %v133_v31 }
  0xb7   :  { %v140_v34 = vmul.f32 %v134_v33, %v134_v33  ;;  %v155_v35 = vmul.f32 0.7978846, %v151_v32  ;;  %v818_v36 = vpop.eup %817 }
  0xb8   :  { %v162_v40 = vadd.f32 1.0, %v818_v36 }
  0xb9   :  { %v144_v37 = vmul.f32 %v140_v34, %v134_v33  ;;  %819 = vtanh.f32 %v155_v35  ;;  %v797_v35 = vld [vmem:[%s1062_s6] sm:$0xff] }
  0xba   :  { %v166_v47 = vmul.f32 0.5, %v162_v40 }
  0xbb   :  { %v148_v38 = vmul.f32 0.044715, %v144_v37 }
  0xbc   :  { %v135_v39 = vpop.f32.mrf.mxu2  ;;  %v170_v51 = vmul.f32 %v166_v47, %v129_v20  ;;  %v800_v20 = vld [vmem:[%s1062_s6 + $0x18] sm:$0xff] }
  0xbd   :  { %v152_v41 = vadd.f32 %v148_v38, %v134_v33  ;;  %v136_v42 = vadd.f32 %v813_v17, %v135_v39  ;;  %394 = vmatpush.bf16.msrb.mxu2 %v800_v20 }
  0xbf   :  { %v820_v43 = vpop.eup %819  ;;  %v141_v44 = vmul.f32 %v136_v42, %v136_v42  ;;  %v156_v45 = vmul.f32 0.7978846, %v152_v41 }
  0xc0   :  { %v163_v46 = vadd.f32 1.0, %v820_v43 }
  0xc1   :  { %v145_v48 = vmul.f32 %v141_v44, %v136_v42  ;;  %821 = vtanh.f32 %v156_v45  ;;  %395 = vmatpush.bf16.msrb.mxu2 %v799_v24 }
  0xc2   :  { %v167_v49 = vmul.f32 0.5, %v163_v46 }
  0xc3   :  { %v149_v50 = vmul.f32 0.044715, %v145_v48 }
  0xc4   :  { %v171_v52 = vmul.f32 %v167_v49, %v131_v26 }
  0xc5   :  { %v153_v53 = vadd.f32 %v149_v50, %v136_v42  ;;  %396 = vmatpush.bf16.msrb.mxu2 %v798_v28 }
  0xc6   :  { %v174_v54 = vpack.c.bf16 %v171_v52, %v170_v51 }
  0xc7   :  { %v157_v55 = vmul.f32 0.7978846, %v153_v53  ;;  %v822_v56 = vpop.eup %821 }
  0xc8   :  { %252 = vmatmul.bf16.vlgmr.msra.gmra.mxu1 %v174_v54  ;;  %v164_v57 = vadd.f32 1.0, %v822_v56 }
  0xc9   :  { %823 = vtanh.f32 %v157_v55  ;;  %397 = vmatpush.bf16.msrb.mxu2 %v797_v35 }
  0xca   :  { %v168_v60 = vmul.f32 0.5, %v164_v57 }
  0xcc   :  { %v172_v62 = vmul.f32 %v168_v60, %v134_v33 }
  0xcf   :  { %v824_v58 = vpop.eup %823 }
  0xd0   :  { %v165_v59 = vadd.f32 1.0, %v824_v58 }
  0xd2   :  { %v169_v61 = vmul.f32 0.5, %v165_v59 }
  0xd4   :  { %v173_v63 = vmul.f32 %v169_v61, %v136_v42 }
  0xd6   :  { %v175_v0 = vpack.c.bf16 %v173_v63, %v172_v62  ;;  %v812_v63 = vld [vmem:[%s1065_s8 + $0x38] sm:$0xff] }
  0xd7   :  { %576 = vmatpush.bf16.msra.mxu0 %v812_v63 }
  0xd8   :  { %257 = vmatmul.bf16.gmra.mxu1 %v175_v0  ;;  %v460_v0 = vpop.f32.mrf.mxu3 }
  0xdb   :  { %577 = vmatpush.bf16.msra.mxu0 %v811_v1 }
  0xdf   :  { %578 = vmatpush.bf16.msra.mxu0 %v810_v2 }
  0xe0   :  { %v462_v4 = vpop.f32.mrf.mxu3 }
  0xe3   :  { %579 = vmatpush.bf16.msra.mxu0 %v809_v3 }
  0xe7   :  { %580 = vmatpush.bf16.msra.mxu0 %v808_v5 }
  0xe8   :  { %v465_v10 = vpop.f32.mrf.mxu3 }
  0xf0   :  { %v467_v14 = vpop.f32.mrf.mxu3 }
 0x145   :  { %v253_v6 = vpop.f32.mrf.mxu1 }
 0x146   :  { %v254_v21 = vadd.f32 %v814_v18, %v253_v6  ;;  %v807_v6 = vld [vmem:[%s1065_s8 + $0x10] sm:$0xff] }
 0x147   :  { %581 = vmatpush.bf16.msra.mxu0 %v807_v6 }
 0x14b   :  { %582 = vmatpush.bf16.msra.mxu0 %v806_v7 }
 0x14d   :  { %v255_v12 = vpop.f32.mrf.mxu1 }
 0x14e   :  { %v256_v19 = vadd.f32 %v814_v18, %v255_v12  ;;  %v815_v12 = vld [vmem:[%s1063_s7] ss:$0 sm:$0xff] }
 0x14f   :  { %583 = vmatpush.bf16.msra.mxu0 %v805_v11 }
 0x150   :  { %v263_v23 = vmax.f32 %v254_v21, %v256_v19 }
 0x155   :  { %v258_v17 = vpop.f32.mrf.mxu1 }
 0x156   :  { %v259_v22 = vadd.f32 %v814_v18, %v258_v17 }
 0x158   :  { %v264_v8 = vmax.f32 %v263_v23, %v259_v22 }
 0x15d   :  { %v260_v25 = vpop.f32.mrf.mxu1 }
 0x15e   :  { %v261_v26 = vadd.f32 %v814_v18, %v260_v25 }
 0x160   :  { %v265_v27 = vmax.f32 %v264_v8, %v261_v26 }
 0x162   :  { %v266_v29 = vsub.f32 %v254_v21, %v265_v27  ;;  %v272_v30 = vsub.f32 %v256_v19, %v265_v27  ;;  %v278_v31 = vsub.f32 %v259_v22, %v265_v27  ;;  %v284_v32 = vsub.f32 %v261_v26, %v265_v27 }
 0x164   :  { %v267_v33 = vmul.f32 1.442695, %v266_v29  ;;  %v273_v34 = vmul.f32 1.442695, %v272_v30  ;;  %v279_v36 = vmul.f32 1.442695, %v278_v31 }
 0x165   :  { %v285_v37 = vmul.f32 1.442695, %v284_v32 }
 0x166   :  { %825 = vpow2.f32 %v267_v33 }
 0x167   :  { %827 = vpow2.f32 %v273_v34 }
 0x168   :  { %829 = vpow2.f32 %v279_v36 }
 0x169   :  { %831 = vpow2.f32 %v285_v37 }
 0x16c   :  { %v826_v38 = vpop.eup %825 }
 0x16d   :  { %v828_v39 = vpop.eup %827  ;;  %v270_v45 = vmul.f32 %v826_v38, %v254_v21 }
 0x16e   :  { %v275_v40 = vadd.f32 %v828_v39, %v826_v38  ;;  %v830_v41 = vpop.eup %829  ;;  %v276_v46 = vmul.f32 %v828_v39, %v256_v19 }
 0x16f   :  { %v832_v43 = vpop.eup %831  ;;  %v282_v9 = vmul.f32 %v830_v41, %v259_v22 }
 0x170   :  { %v281_v42 = vadd.f32 %v830_v41, %v275_v40  ;;  %v277_v48 = vadd.f32 %v276_v46, %v270_v45  ;;  %v288_v55 = vmul.f32 %v832_v43, %v261_v26 }
 0x172   :  { %v287_v44 = vadd.f32 %v832_v43, %v281_v42  ;;  %v283_v52 = vadd.f32 %v282_v9, %v277_v48 }
 0x174   :  { %833 = vrcp.f32 %v287_v44  ;;  %v301_v51 = vand.u32 2147483648, %v287_v44  ;;  %v299_v54 = vand.u32 2147483647, %v287_v44  ;;  %vm295_vm1 = vweird.f32 %v287_v44 }
 0x175   :  { %v289_v58 = vadd.f32 %v288_v55, %v283_v52 }
 0x176   :  { %v302_v57 = vor.u32 1.1754944e-38, %v301_v51  ;;  %vm300_vm3 = vcmp.eq.f32.partialorder %v299_v54, 8.507059e+37 }
 0x17a   :  { %v834_v47 = vpop.eup %833 }
 0x17b   :  { %v291_v49 = vmul.f32 %v834_v47, %v287_v44  ;;  %vm296_vm0 = vweird.f32 %v834_v47 }
 0x17c   :  { %vm297_vm2 = vmor %vm295_vm1, %vm296_vm0 }
 0x17d   :  { %v292_v50 = vsub.f32 1.0, %v291_v49 }
 0x17f   :  { %v293_v53 = vmul.f32 %v834_v47, %v292_v50 }
 0x181   :  { %v294_v56 = vadd.f32 %v834_v47, %v293_v53 }
 0x183   :  { %v298_v59 = vsel %vm297_vm2, %v834_v47, %v294_v56 }
 0x184   :  { %v303_v60 = vsel %vm300_vm3, %v302_v57, %v298_v59  ;;  %v816_v57 = vld [vmem:[%s1064_s9] ss:$0 sm:$0xff] }
 0x185   :  { %v304_v61 = vmul.f32 %v303_v60, %v289_v58 }
 0x187   :  { %v321_v62 = vpack.c.bf16 %v304_v61, %v304_v61 }
 0x189   :  { %398 = vmatmul.bf16.vlgmr.msrb.gmra.mxu2 %v321_v62 }
 0x20c   :  { %v399_v13 = vpop.f32.mrf.mxu2 }
 0x20d   :  { %v400_v15 = vadd.f32 %v815_v12, %v399_v13 }
 0x20f   :  { %v461_v16 = vadd.f32 %v460_v0, %v400_v15  ;;  %v463_v17 = vadd.f32 %v462_v4, %v400_v15  ;;  %v466_v18 = vadd.f32 %v465_v10, %v400_v15  ;;  %v468_v19 = vadd.f32 %v467_v14, %v400_v15 }
 0x211   :  { %v473_v20 = vmul.f32 %v468_v19, %v468_v19  ;;  %v470_v21 = vmul.f32 %v461_v16, %v461_v16  ;;  %v471_v22 = vmul.f32 %v463_v17, %v463_v17  ;;  %v472_v23 = vmul.f32 %v466_v18, %v466_v18 }
 0x213   :  { %v474_v24 = vmul.f32 %v470_v21, %v461_v16  ;;  %v475_v25 = vmul.f32 %v471_v22, %v463_v17  ;;  %v476_v8 = vmul.f32 %v472_v23, %v466_v18  ;;  %v477_v26 = vmul.f32 %v473_v20, %v468_v19 }
 0x214   :  { %v401_v27 = vpop.f32.mrf.mxu2 }
 0x215   :  { %v478_v28 = vmul.f32 0.044715, %v474_v24  ;;  %v479_v29 = vmul.f32 0.044715, %v475_v25  ;;  %v480_v32 = vmul.f32 0.044715, %v476_v8 }
 0x216   :  { %v481_v33 = vmul.f32 0.044715, %v477_v26 }
 0x217   :  { %v482_v30 = vadd.f32 %v478_v28, %v461_v16  ;;  %v483_v31 = vadd.f32 %v479_v29, %v463_v17  ;;  %v484_v36 = vadd.f32 %v480_v32, %v466_v18 }
 0x218   :  { %v485_v37 = vadd.f32 %v481_v33, %v468_v19 }
 0x219   :  { %v486_v34 = vmul.f32 0.7978846, %v482_v30  ;;  %v487_v35 = vmul.f32 0.7978846, %v483_v31  ;;  %v488_v38 = vmul.f32 0.7978846, %v484_v36 }
 0x21a   :  { %v489_v39 = vmul.f32 0.7978846, %v485_v37 }
 0x21b   :  { %835 = vtanh.f32 %v486_v34 }
 0x21c   :  { %837 = vtanh.f32 %v487_v35 }
 0x21d   :  { %839 = vtanh.f32 %v488_v38 }
 0x21e   :  { %841 = vtanh.f32 %v489_v39 }
 0x221   :  { %v836_v40 = vpop.eup %835 }
 0x222   :  { %v838_v41 = vpop.eup %837  ;;  %v494_v42 = vadd.f32 1.0, %v836_v40 }
 0x223   :  { %v495_v43 = vadd.f32 1.0, %v838_v41  ;;  %v840_v48 = vpop.eup %839 }
 0x224   :  { %v498_v44 = vmul.f32 0.5, %v494_v42  ;;  %v842_v9 = vpop.eup %841  ;;  %v496_v50 = vadd.f32 1.0, %v840_v48 }
 0x225   :  { %v499_v45 = vmul.f32 0.5, %v495_v43  ;;  %v497_v51 = vadd.f32 1.0, %v842_v9 }
 0x226   :  { %v502_v46 = vmul.f32 %v498_v44, %v461_v16  ;;  %v500_v52 = vmul.f32 0.5, %v496_v50 }
 0x227   :  { %v503_v47 = vmul.f32 %v499_v45, %v463_v17  ;;  %v501_v53 = vmul.f32 0.5, %v497_v51 }
 0x228   :  { %v504_v54 = vmul.f32 %v500_v52, %v466_v18 }
 0x229   :  { %v506_v49 = vpack.c.bf16 %v503_v47, %v502_v46  ;;  %v505_v55 = vmul.f32 %v501_v53, %v468_v19 }
 0x22b   :  { %584 = vmatmul.bf16.vlgmr.msra.gmra.mxu0 %v506_v49  ;;  %v507_v56 = vpack.c.bf16 %v505_v55, %v504_v54 }
 0x23b   :  { %589 = vmatmul.bf16.gmra.mxu0 %v507_v56 }
 0x2a8   :  { %v585_v58 = vpop.f32.mrf.mxu0 }
 0x2a9   :  { %v586_v59 = vadd.f32 %v816_v57, %v585_v58 }
 0x2ab   :  { %595 = vst [vmem:[%s1066_s10] sm:$0xff] %v586_v59 }
 0x2b0   :  { %v587_v60 = vpop.f32.mrf.mxu0 }
 0x2b1   :  { %v588_v61 = vadd.f32 %v816_v57, %v587_v60 }
 0x2b3   :  { %596 = vst [vmem:[%s1066_s10 + $0x8] sm:$0xff] %v588_v61 }
 0x2b8   :  { %v590_v62 = vpop.f32.mrf.mxu0 }
 0x2b9   :  { %v591_v63 = vadd.f32 %v816_v57, %v590_v62 }
 0x2bb   :  { %597 = vst [vmem:[%s1066_s10 + $0x10] sm:$0xff] %v591_v63 }
 0x2c0   :  { %v592_v0 = vpop.f32.mrf.mxu0 }
 0x2c1   :  { %v593_v1 = vadd.f32 %v816_v57, %v592_v0 }
 0x2c3   :  { %598 = vst [vmem:[%s1066_s10 + $0x18] sm:$0xff] %v593_v1 }

</bundles_post_ra>
